<compile_context>
chip_gen: v6e
topology: v6e:2x2x1
jax: 0.10.0
libtpu: 0.0.40
codegen_flags: <defaults>
</compile_context>

<pallas_src>
import jax
import jax.numpy as jnp
from jax.experimental import pallas as pl
from jax.experimental.pallas import tpu as pltpu

# ----------------------------- model sizes ---------------------------------
SEQ_LEN = 5
BATCH = 2
INPUT_SIZE = 9
HIDDEN = 16
NUM_LAYERS = 1

# --------------------------- packed layout sizes ---------------------------
I_PAD = 16                 # input_size padded 9 -> 16 lanes (contraction padding)
WIH_ROWS = 16              # W_ih^T rows padded 9 -> 16 (2 sublane tiles)
WHH_ROWS = 16              # W_hh^T rows
MISC_ROWS = 8              # row0 = b_ih+b_hh, row1 = w_out row, row2 = b_out bcast
PARAM_ROWS = WIH_ROWS + WHH_ROWS + MISC_ROWS   # 40
HS_ROWS = 16               # per-step hidden states: S*B = 10 -> padded to 16
OUT_ROWS, OUT_LANES = 8, 128                    # single lane-dense output slab


# ------------------------------ kernel -------------------------------------
def rnn_kernel(x_ref, p_ref, o_ref, hs_ref):
    # x_ref : (S*B, 16)  flattened input (seq-major), lanes 9..15 zero-padded
    # p_ref : (40, 16)   packed params:
    #                      rows  0..15 : W_ih^T  (9,16) zero-padded to (16,16)
    #                      rows 16..31 : W_hh^T  (16,16)
    #                      rows 32..39 : row0 b_ih+b_hh | row1 W_out row | row2 b_out bcast
    # o_ref : (8, 128)   packed output slab:
    #                      row 0, lanes 0..S*B-1 : per-timestep Linear output (lane-major)
    #                      rows 1..B, lanes 0..H-1 : final hidden state
    # hs_ref: (16, 16)   VMEM scratch holding every per-step hidden state
    S, B, H = SEQ_LEN, BATCH, HIDDEN
    hi = jax.lax.Precision.HIGHEST

    # ---- carve the packed parameter slab (static, sublane-aligned views) ----
    wih = p_ref[0:WIH_ROWS, :]                              # (16,16)
    whh = p_ref[WIH_ROWS:WIH_ROWS + WHH_ROWS, :]            # (16,16)
    misc = p_ref[WIH_ROWS + WHH_ROWS:PARAM_ROWS, :]         # (8,16)
    b_rnn = misc[0:1, :]                                    # (1,16)  b_ih + b_hh
    wout_row = misc[1:2, :]                                 # (1,16)  W_out as a row
    bout_row = misc[2:3, :]                                 # (1,16)  b_out broadcast

    # ---- prologue: hoisted input projection + fused RNN bias (one MXU push) --
    xproj = (jnp.dot(x_ref[...], wih,
                     preferred_element_type=jnp.float32, precision=hi)
             + b_rnn)                                       # (S*B, H)

    # ---- recurrence: only the serial h @ W_hh^T dependency stays per step ----
    # S is a small compile-time constant -> fully unrolled at trace time; every
    # slice offset is static.  Per-step hidden states go straight into VMEM
    # scratch (vst slot, overlaps the serial MXU/EUP chain) instead of being
    # concatenated at the end.
    hs_ref[...] = jnp.zeros_like(hs_ref)                    # zero pad rows S*B..15
    h = jnp.zeros((B, H), jnp.float32)
    for t in range(S):
        h = jnp.tanh(xproj[t * B:(t + 1) * B, :]
                     + jnp.dot(h, whh,
                               preferred_element_type=jnp.float32, precision=hi))
        hs_ref[t * B:(t + 1) * B, :] = h

    # ---- epilogue: VPU output projection + single lane-dense output slab ----
    hs_all = hs_ref[...]                                    # (16, 16)
    # (10,16)@(16,1) would waste the MXU and force a width-1 layout; VPU mul +
    # lane reduce is cheaper and lands lane-major naturally.
    o_row = (jnp.sum(hs_all * wout_row, axis=1).reshape(1, HS_ROWS)
             + bout_row)                                    # (1,16); lanes >= S*B unused

    o_ref[...] = jnp.zeros((OUT_ROWS, OUT_LANES), jnp.float32)
    o_ref[0:1, 0:HS_ROWS] = o_row                           # per-step outputs, lane-major
    o_ref[1:1 + B, 0:H] = h                                 # final hidden state


# ------------------------------ wrapper -------------------------------------
def rnn_net_forward(x, params):
    """x: (seq, batch, input_size) float32. Returns (o, hidden) like RNNnet.forward."""
    S, B, I = x.shape
    H = params["w_hh"].shape[0]

    # --- pack the input: (S,B,I) -> (S*B, 16), lanes I..15 zeroed -------------
    x2d = x.reshape(S * B, I).astype(jnp.float32)
    x_pad = jnp.zeros((S * B, I_PAD), jnp.float32).at[:, :I].set(x2d)

    # --- pack ALL parameters into one slab (could be precomputed once) -------
    wih_blk = jnp.zeros((WIH_ROWS, H), jnp.float32).at[:I, :].set(
        params["w_ih"].T.astype(jnp.float32))                       # (16,16)
    whh_blk = params["w_hh"].T.astype(jnp.float32)                  # (16,16)
    misc = jnp.zeros((MISC_ROWS, H), jnp.float32)
    misc = misc.at[0, :].set((params["b_ih"] + params["b_hh"]).astype(jnp.float32))
    misc = misc.at[1, :].set(params["w_out"].reshape(H).astype(jnp.float32))
    misc = misc.at[2, :].set(jnp.broadcast_to(
        params["b_out"].reshape(()).astype(jnp.float32), (H,)))
    p_slab = jnp.concatenate([wih_blk, whh_blk, misc], axis=0)      # (40,16)

    vmem = pl.BlockSpec(memory_space=pltpu.MemorySpace.VMEM)

    slab = pl.pallas_call(
        rnn_kernel,
        out_shape=jax.ShapeDtypeStruct((OUT_ROWS, OUT_LANES), jnp.float32),
        in_specs=[vmem, vmem],          # 2 input DMAs: x + packed params
        out_specs=vmem,                 # 1 lane-dense output DMA
        scratch_shapes=[pltpu.VMEM((HS_ROWS, HIDDEN), jnp.float32)],
    )(x_pad, p_slab)

    # --- unpack the output slab ----------------------------------------------
    o = slab[0, :S * B].reshape(S, B, 1)                    # (seq, batch, 1)
    hidden = slab[1:1 + B, :H].reshape(NUM_LAYERS, B, H)    # (num_layers, batch, hidden)
    return o, hidden


# --------------------------- reference (pure JAX) ----------------------------
def rnn_net_reference(x, params):
    S, B, I = x.shape
    H = params["w_hh"].shape[0]
    hi = jax.lax.Precision.HIGHEST
    h = jnp.zeros((B, H), jnp.float32)
    outs = []
    for t in range(S):
        h = jnp.tanh(jnp.dot(x[t], params["w_ih"].T, precision=hi) + params["b_ih"]
                     + jnp.dot(h, params["w_hh"].T, precision=hi) + params["b_hh"])
        outs.append(jnp.dot(h, params["w_out"].T, precision=hi) + params["b_out"])
    o = jnp.stack(outs, axis=0)
    return o, h.reshape(NUM_LAYERS, B, H)


# ------------------------------- main ----------------------------------------
if __name__ == "__main__":
    key = jax.random.PRNGKey(0)
    k_x, k1, k2, k3, k4, k5, k6 = jax.random.split(key, 7)

    # Deterministic parameter init (PyTorch-style U(-1/sqrt(H), 1/sqrt(H))).
    bound = 1.0 / jnp.sqrt(jnp.float32(HIDDEN))
    params = {
        "w_ih": jax.random.uniform(k1, (HIDDEN, INPUT_SIZE), jnp.float32, -bound, bound),
        "w_hh": jax.random.uniform(k2, (HIDDEN, HIDDEN), jnp.float32, -bound, bound),
        "b_ih": jax.random.uniform(k3, (HIDDEN,), jnp.float32, -bound, bound),
        "b_hh": jax.random.uniform(k4, (HIDDEN,), jnp.float32, -bound, bound),
        "w_out": jax.random.uniform(k5, (1, HIDDEN), jnp.float32, -bound, bound),
        "b_out": jax.random.uniform(k6, (1,), jnp.float32, -bound, bound),
    }

    # Input matching nn.RNN's expected (seq, batch, input_size) layout.
    x = jax.random.normal(k_x, (SEQ_LEN, BATCH, INPUT_SIZE), jnp.float32)

    o, hidden = rnn_net_forward(x, params)
    o = jax.block_until_ready(o)
    hidden = jax.block_until_ready(hidden)

    assert o.shape == (SEQ_LEN, BATCH, 1)
    assert hidden.shape == (NUM_LAYERS, BATCH, HIDDEN)

    o_ref, h_ref = rnn_net_reference(x, params)
    assert jnp.allclose(o, o_ref, atol=1e-5), "output mismatch vs reference"
    assert jnp.allclose(hidden, h_ref, atol=1e-5), "hidden mismatch vs reference"

    print("KERNEL_OK")
</pallas_src>

<mosaic_0001>
module attributes {stable_mosaic.version = 11 : i64} {
  func.func @rnn_kernel(%arg0: memref<10x16xf32, #tpu.memory_space<vmem>>, %arg1: memref<40x16xf32, #tpu.memory_space<vmem>>, %arg2: memref<8x128xf32, #tpu.memory_space<vmem>>, %arg3: memref<16x16xf32, #tpu.memory_space<vmem>>) attributes {dimension_semantics = [], scalar_prefetch = 0 : i64, scratch_operands = 1 : i64, tpu.core_type = #tpu.core_type<tc>} {
    %c0 = arith.constant 0 : index
    %c0_0 = arith.constant 0 : index
    %0 = vector.load %arg1[%c0, %c0_0] : memref<40x16xf32, #tpu.memory_space<vmem>>, vector<16x16xf32>
    %c16 = arith.constant 16 : index
    %c0_1 = arith.constant 0 : index
    %1 = vector.load %arg1[%c16, %c0_1] : memref<40x16xf32, #tpu.memory_space<vmem>>, vector<16x16xf32>
    %c32 = arith.constant 32 : index
    %c0_2 = arith.constant 0 : index
    %2 = vector.load %arg1[%c32, %c0_2] : memref<40x16xf32, #tpu.memory_space<vmem>>, vector<8x16xf32>
    %3 = vector.extract_strided_slice %2 {offsets = [0, 0], sizes = [1, 16], strides = [1, 1]} : vector<8x16xf32> to vector<1x16xf32>
    %4 = vector.extract_strided_slice %2 {offsets = [1, 0], sizes = [1, 16], strides = [1, 1]} : vector<8x16xf32> to vector<1x16xf32>
    %5 = vector.extract_strided_slice %2 {offsets = [2, 0], sizes = [1, 16], strides = [1, 1]} : vector<8x16xf32> to vector<1x16xf32>
    %c0_3 = arith.constant 0 : index
    %c0_4 = arith.constant 0 : index
    %6 = vector.load %arg0[%c0_3, %c0_4] : memref<10x16xf32, #tpu.memory_space<vmem>>, vector<10x16xf32>
    %cst = arith.constant dense<0.000000e+00> : vector<10x16xf32>
    %7 = tpu.matmul %6, %0, %cst {dimension_numbers = #tpu.dot_dimension_numbers<[1], [0], [0], [1], [0, 0, 1, 1], [], []>, precision = #tpu.contract_precision<fp32>} : vector<10x16xf32>, vector<16x16xf32>, vector<10x16xf32> -> vector<10x16xf32>
    %8 = vector.broadcast %3 : vector<1x16xf32> to vector<10x16xf32>
    %9 = arith.addf %7, %8 : vector<10x16xf32>
    %cst_5 = arith.constant 0.000000e+00 : f32
    %10 = vector.broadcast %cst_5 : f32 to vector<16x16xf32>
    %c0_6 = arith.constant 0 : index
    %c0_7 = arith.constant 0 : index
    %11 = vector.load %arg3[%c0_6, %c0_7] : memref<16x16xf32, #tpu.memory_space<vmem>>, vector<16x16xf32>
    tpu.vector_store %arg3[%c0_6, %c0_7], %10 {strides = array<i32>} : memref<16x16xf32, #tpu.memory_space<vmem>>, vector<16x16xf32>,
    %cst_8 = arith.constant 0.000000e+00 : f32
    %12 = vector.broadcast %cst_8 : f32 to vector<2x16xf32>
    %13 = vector.extract_strided_slice %9 {offsets = [0, 0], sizes = [2, 16], strides = [1, 1]} : vector<10x16xf32> to vector<2x16xf32>
    %cst_9 = arith.constant dense<0.000000e+00> : vector<2x16xf32>
    %14 = tpu.matmul %12, %1, %cst_9 {dimension_numbers = #tpu.dot_dimension_numbers<[1], [0], [0], [1], [0, 0, 1, 1], [], []>, precision = #tpu.contract_precision<fp32>} : vector<2x16xf32>, vector<16x16xf32>, vector<2x16xf32> -> vector<2x16xf32>
    %15 = arith.addf %13, %14 : vector<2x16xf32>
    %16 = math.tanh %15 : vector<2x16xf32>
    %c0_10 = arith.constant 0 : index
    %c0_11 = arith.constant 0 : index
    %17 = vector.load %arg3[%c0_10, %c0_11] : memref<16x16xf32, #tpu.memory_space<vmem>>, vector<2x16xf32>
    tpu.vector_store %arg3[%c0_10, %c0_11], %16 {strides = array<i32>} : memref<16x16xf32, #tpu.memory_space<vmem>>, vector<2x16xf32>,
    %18 = vector.extract_strided_slice %9 {offsets = [2, 0], sizes = [2, 16], strides = [1, 1]} : vector<10x16xf32> to vector<2x16xf32>
    %cst_12 = arith.constant dense<0.000000e+00> : vector<2x16xf32>
    %19 = tpu.matmul %16, %1, %cst_12 {dimension_numbers = #tpu.dot_dimension_numbers<[1], [0], [0], [1], [0, 0, 1, 1], [], []>, precision = #tpu.contract_precision<fp32>} : vector<2x16xf32>, vector<16x16xf32>, vector<2x16xf32> -> vector<2x16xf32>
    %20 = arith.addf %18, %19 : vector<2x16xf32>
    %21 = math.tanh %20 : vector<2x16xf32>
    %c2 = arith.constant 2 : index
    %c0_13 = arith.constant 0 : index
    %22 = vector.load %arg3[%c2, %c0_13] : memref<16x16xf32, #tpu.memory_space<vmem>>, vector<2x16xf32>
    tpu.vector_store %arg3[%c2, %c0_13], %21 {strides = array<i32>} : memref<16x16xf32, #tpu.memory_space<vmem>>, vector<2x16xf32>,
    %23 = vector.extract_strided_slice %9 {offsets = [4, 0], sizes = [2, 16], strides = [1, 1]} : vector<10x16xf32> to vector<2x16xf32>
    %cst_14 = arith.constant dense<0.000000e+00> : vector<2x16xf32>
    %24 = tpu.matmul %21, %1, %cst_14 {dimension_numbers = #tpu.dot_dimension_numbers<[1], [0], [0], [1], [0, 0, 1, 1], [], []>, precision = #tpu.contract_precision<fp32>} : vector<2x16xf32>, vector<16x16xf32>, vector<2x16xf32> -> vector<2x16xf32>
    %25 = arith.addf %23, %24 : vector<2x16xf32>
    %26 = math.tanh %25 : vector<2x16xf32>
    %c4 = arith.constant 4 : index
    %c0_15 = arith.constant 0 : index
    %27 = vector.load %arg3[%c4, %c0_15] : memref<16x16xf32, #tpu.memory_space<vmem>>, vector<2x16xf32>
    tpu.vector_store %arg3[%c4, %c0_15], %26 {strides = array<i32>} : memref<16x16xf32, #tpu.memory_space<vmem>>, vector<2x16xf32>,
    %28 = vector.extract_strided_slice %9 {offsets = [6, 0], sizes = [2, 16], strides = [1, 1]} : vector<10x16xf32> to vector<2x16xf32>
    %cst_16 = arith.constant dense<0.000000e+00> : vector<2x16xf32>
    %29 = tpu.matmul %26, %1, %cst_16 {dimension_numbers = #tpu.dot_dimension_numbers<[1], [0], [0], [1], [0, 0, 1, 1], [], []>, precision = #tpu.contract_precision<fp32>} : vector<2x16xf32>, vector<16x16xf32>, vector<2x16xf32> -> vector<2x16xf32>
    %30 = arith.addf %28, %29 : vector<2x16xf32>
    %31 = math.tanh %30 : vector<2x16xf32>
    %c6 = arith.constant 6 : index
    %c0_17 = arith.constant 0 : index
    %32 = vector.load %arg3[%c6, %c0_17] : memref<16x16xf32, #tpu.memory_space<vmem>>, vector<2x16xf32>
    tpu.vector_store %arg3[%c6, %c0_17], %31 {strides = array<i32>} : memref<16x16xf32, #tpu.memory_space<vmem>>, vector<2x16xf32>,
    %33 = vector.extract_strided_slice %9 {offsets = [8, 0], sizes = [2, 16], strides = [1, 1]} : vector<10x16xf32> to vector<2x16xf32>
    %cst_18 = arith.constant dense<0.000000e+00> : vector<2x16xf32>
    %34 = tpu.matmul %31, %1, %cst_18 {dimension_numbers = #tpu.dot_dimension_numbers<[1], [0], [0], [1], [0, 0, 1, 1], [], []>, precision = #tpu.contract_precision<fp32>} : vector<2x16xf32>, vector<16x16xf32>, vector<2x16xf32> -> vector<2x16xf32>
    %35 = arith.addf %33, %34 : vector<2x16xf32>
    %36 = math.tanh %35 : vector<2x16xf32>
    %c8 = arith.constant 8 : index
    %c0_19 = arith.constant 0 : index
    %37 = vector.load %arg3[%c8, %c0_19] : memref<16x16xf32, #tpu.memory_space<vmem>>, vector<2x16xf32>
    tpu.vector_store %arg3[%c8, %c0_19], %36 {strides = array<i32>} : memref<16x16xf32, #tpu.memory_space<vmem>>, vector<2x16xf32>,
    %c0_20 = arith.constant 0 : index
    %c0_21 = arith.constant 0 : index
    %38 = vector.load %arg3[%c0_20, %c0_21] : memref<16x16xf32, #tpu.memory_space<vmem>>, vector<16x16xf32>
    %39 = vector.broadcast %4 : vector<1x16xf32> to vector<16x16xf32>
    %40 = arith.mulf %38, %39 : vector<16x16xf32>
    %cst_22 = arith.constant dense<0.000000e+00> : vector<16xf32>
    %41 = vector.multi_reduction <add>, %40, %cst_22 [1] : vector<16x16xf32> to vector<16xf32>
    %42 = vector.shape_cast %41 : vector<16xf32> to vector<1x16xf32>
    %43 = arith.addf %42, %5 : vector<1x16xf32>
    %cst_23 = arith.constant 0.000000e+00 : f32
    %44 = vector.broadcast %cst_23 : f32 to vector<8x128xf32>
    %c0_24 = arith.constant 0 : index
    %c0_25 = arith.constant 0 : index
    %45 = vector.load %arg2[%c0_24, %c0_25] : memref<8x128xf32, #tpu.memory_space<vmem>>, vector<8x128xf32>
    tpu.vector_store %arg2[%c0_24, %c0_25], %44 {strides = array<i32>} : memref<8x128xf32, #tpu.memory_space<vmem>>, vector<8x128xf32>,
    %c0_26 = arith.constant 0 : index
    %c0_27 = arith.constant 0 : index
    %46 = vector.load %arg2[%c0_26, %c0_27] : memref<8x128xf32, #tpu.memory_space<vmem>>, vector<1x16xf32>
    tpu.vector_store %arg2[%c0_26, %c0_27], %43 {strides = array<i32>} : memref<8x128xf32, #tpu.memory_space<vmem>>, vector<1x16xf32>,
    %c1 = arith.constant 1 : index
    %c0_28 = arith.constant 0 : index
    %47 = vector.load %arg2[%c1, %c0_28] : memref<8x128xf32, #tpu.memory_space<vmem>>, vector<2x16xf32>
    tpu.vector_store %arg2[%c1, %c0_28], %36 {strides = array<i32>} : memref<8x128xf32, #tpu.memory_space<vmem>>, vector<2x16xf32>,
    return
  }
}

</mosaic_0001>

<bundles_post_ra>
// kernel: tpu_custom_call.1
= control target key start
LH: loop header
LB: loop body
LE: loop exit
PB: predicated region body
PF: predicated region fallthrough
CT: control target
= control target key end

     0   :  { %vm23_vm0 = vcmask 130048   ;;  %v3349_v7 = vmov 0.0   ;;  %s3671_s0 = inlined_call_operand.vmem [shape: f32[10,16], index: 0, kind: input, shape index: {}]   ;;  %s3672_s1 = inlined_call_operand.vmem [shape: f32[40,16], index: 1, kind: input, shape index: {}]   ;;  %s3673_s2 = inlined_call_operand.hbm [shape: f32[8,128], index: 2, kind: output, shape index: {}]  }
   0x1   :  { %v13_v0 = vld [vmem:[%s3672_s1 + $0x8] sm:$0xff]  ;;  %v12_v1 = vld [vmem:[%s3672_s1] sm:$0xff]  ;;  %532 = vst.msk [vmem:[#allocation2] sm:$0xff] %vm23_vm0, %v3349_v7  ;;  %533 = vst.msk [vmem:[#allocation2 + $0x8] sm:$0xff] %vm23_vm0, %v3349_v7 }
   0x2   :  { %v17_v2 = vld [vmem:[%s3671_s0] sm:$0xff]  ;;  %v3377_v3 = vand.u32 4294901760, %v13_v0  ;;  %v3379_v4 = vand.u32 4294901760, %v12_v1  ;;  %v18_v6 = vld [vmem:[%s3671_s0 + $0x8] sm:$0x3]  ;;  %2905 = vst [vmem:[#allocation3] sm:$0xff] %v3349_v7 }
   0x3   :  { %v25_v5 = vsel %vm23_vm0, %v17_v2, 0  ;;  %v28_v9 = vsel %vm23_vm0, %v18_v6, 0 }
   0x4   :  { %v3390_v8 = vand.u32 4294901760, %v25_v5  ;;  %3059 = vmatprep.subr.mxu0 %v3377_v3  ;;  %v147_v10 = vsub.f32 %v13_v0, %v3377_v3  ;;  %v3395_v11 = vand.u32 4294901760, %v28_v9  ;;  %v154_v12 = vsub.f32 %v12_v1, %v3379_v4 }
   0x5   :  { %7 = vsyncpa [#allocation4], 0  ;;  %3060 = vmatpush3.msra.mxu0 %v3377_v3  ;;  %v15_v18 = vld [vmem:[%s3672_s1 + $0x18] sm:$0xff]  ;;  %v14_v23 = vld [vmem:[%s3672_s1 + $0x10] sm:$0xff]  ;;  %vm3350_vm1 = vmmov 0   ;;  %v19_v39 = vlaneseq  ;;  %vm998_vm2 = vcmask 123904  }
   0x6   :  { %v98_v13 = vsub.f32 %v25_v5, %v3390_v8  ;;  %3070 = vmatprep.mubr.f32.mxu1 %v3390_v8  ;;  %3061 = vmatprep.subr.mxu0 %v3379_v4  ;;  %v148_v14 = vand.u32 4294901760, %v147_v10  ;;  %v108_v15 = vsub.f32 %v28_v9, %v3395_v11  ;;  %v155_v16 = vand.u32 4294901760, %v154_v12  ;;  %v3510_v42 = vld [vmem:[%s3672_s1 + $0x20] sm:$0xff]  ;;  %s3352_s1 = smov [#allocation3]  }
   0x7   :  { %3062 = vmatpush3.msra.mxu0 %v3379_v4  ;;  %v3410_v27 = vand.u32 4294901760, %v15_v18  ;;  %v3412_v30 = vand.u32 4294901760, %v14_v23  ;;  %v3504_v40 = vshrl.u32 %v19_v39, 7  ;;  %vm1467_vm3 = vcmask 125954   ;;  %s2937_s22 = sshll.u32 %s3352_s1, 4  ;;  %s2938_s22 = int_to_ptr.vmem [resolvable:$true] %s2937_s22 }
   0x8   :  { %v99_v17 = vand.u32 4294901760, %v98_v13  ;;  %v149_v19 = vsub.f32 %v147_v10, %v148_v14  ;;  %v109_v20 = vand.u32 4294901760, %v108_v15  ;;  %v156_v21 = vsub.f32 %v154_v12, %v155_v16  ;;  %3073 = vmatprep.subr.mxu0 %v147_v10  ;;  %s3327_s23 = scalar_lea.vmem %s2938_s22, 128  ;;  %p3332_p1 = scmp.lt.s32.totalorder %s2938_s22, %s2938_s22 }
   0x9   :  { %v3415_v31 = vsub.f32 %v15_v18, %v3410_v27  ;;  %v3419_v32 = vsub.f32 %v14_v23, %v3412_v30  ;;  %v21_v41 = vsub.s32 0, %v3504_v40  ;;  %vm1937_vm4 = vcmask 128004   ;;  %p3328_p0 = scmp.ne.s32.totalorder %s2938_s22, %s3327_s23  ;;  %p3333_p2 = scmp.lt.s32.totalorder %s3327_s23, %s3327_s23 }
   0xa   :  { %v100_v22 = vsub.f32 %v98_v13, %v99_v17  ;;  %v150_v24 = vand.u32 4294901760, %v149_v19  ;;  %v110_v25 = vsub.f32 %v108_v15, %v109_v20  ;;  %v157_v26 = vand.u32 4294901760, %v156_v21 }
   0xb   :  { %v3424_v33 = vand.u32 4294901760, %v3415_v31  ;;  %v3429_v34 = vand.u32 4294901760, %v3419_v32  ;;  %v22_v43 = vrot.slane %v3510_v42, %v21_v41  ;;  %vm2407_vm5 = vcmask 130054   ;;  %p3334_p3 = por %p3333_p2, %p3332_p1 }
   0xc   :  { %v101_v28 = vand.u32 4294901760, %v100_v22  ;;  %3066 = vmatprep.subr.mxu1 %v150_v24  ;;  %v111_v29 = vand.u32 4294901760, %v110_v25  ;;  %vm2925_vm6 = vcmask 130112   ;;  %vm2928_vm7 = vcmask 122880  }
   0xd   :  { %3067 = vmatpush3.msra.mxu1 %v150_v24  ;;  %v646_v35 = vsub.f32 %v3415_v31, %v3424_v33  ;;  %v653_v36 = vsub.f32 %v3419_v32, %v3429_v34  ;;  %p3335_p4 = pnand %p3334_p3, %p3328_p0 }
   0xe   :  { %3063 = vmatprep.mubr.f32.mxu0 %v101_v28  ;;  %3068 = vmatprep.subr.mxu1 %v157_v26 }
   0xf   :  { %3064 = vmatmul.mubr.f32.vlgmr.msra.gmra.mxu0 %v111_v29  ;;  %3069 = vmatpush3.msra.mxu1 %v157_v26  ;;  %v3442_v37 = vand.u32 4294901760, %v646_v35  ;;  %v3448_v38 = vand.u32 4294901760, %v653_v36 }
  0x10   :  { %3074 = vmatpush3.msra.mxu0 %v147_v10  ;;  %3071 = vmatmul.mubr.f32.vlgmr.msra.gmra.mxu1 %v3395_v11 }
  0x11   :  { %3075 = vmatprep.subr.mxu0 %v154_v12  ;;  %3080 = vmatprep.subr.mxu1 %v3377_v3 }
  0x12   :  { %3076 = vmatpush3.msra.mxu0 %v154_v12  ;;  %3077 = vmatprep.mubr.f32.mxu0 %v98_v13 }
  0x13   :  { %3081 = vmatpush3.msra.mxu1 %v3377_v3  ;;  %3078 = vmatmul.mubr.f32.vlgmr.msra.gmra.mxu0 %v108_v15 }
  0x14   :  { %3082 = vmatprep.subr.mxu1 %v3379_v4  ;;  %3087 = vmatprep.subr.mxu0 %v148_v14 }
  0x15   :  { %3083 = vmatpush3.msra.mxu1 %v3379_v4  ;;  %3084 = vmatprep.mubr.f32.mxu1 %v99_v17 }
  0x16   :  { %3088 = vmatpush3.msra.mxu0 %v148_v14  ;;  %3085 = vmatmul.mubr.f32.vlgmr.msra.gmra.mxu1 %v109_v20 }
  0x17   :  { %3089 = vmatprep.subr.mxu0 %v155_v16  ;;  %3094 = vmatprep.subr.mxu1 %v3377_v3 }
  0x18   :  { %3090 = vmatpush3.msra.mxu0 %v155_v16  ;;  %3091 = vmatprep.mubr.f32.mxu0 %v3390_v8 }
  0x19   :  { %3095 = vmatpush3.msra.mxu1 %v3377_v3  ;;  %3092 = vmatmul.mubr.f32.vlgmr.msra.gmra.mxu0 %v3395_v11 }
  0x1a   :  { %3096 = vmatprep.subr.mxu1 %v3379_v4  ;;  %3101 = vmatprep.subr.mxu0 %v3349_v7 }
  0x1b   :  { %3097 = vmatpush3.msra.mxu1 %v3379_v4  ;;  %3098 = vmatprep.mubr.f32.mxu1 %v3390_v8 }
  0x1c   :  { %3102 = vmatpush3.msra.mxu0 %v3410_v27  ;;  %3099 = vmatmul.mubr.f32.vlgmr.msra.gmra.mxu1 %v3395_v11 }
  0x1d   :  { %3103 = vmatprep.subr.mxu0 %v3349_v7  ;;  %3108 = vmatprep.subr.mxu1 %v3349_v7 }
  0x1e   :  { %3104 = vmatpush3.msra.mxu0 %v3412_v30  ;;  %3105 = vmatprep.mubr.msk.f32.mxu0 %vm3350_vm1, %v3349_v7 }
  0x1f   :  { %3109 = vmatpush3.msra.mxu1 %v3442_v37  ;;  %3106 = vmatmul.mubr.f32.vlgmr.msra.gmra.mxu0 %v3349_v7 }
  0x20   :  { %3110 = vmatprep.subr.mxu1 %v3349_v7  ;;  %3115 = vmatprep.subr.mxu0 %v3349_v7 }
  0x21   :  { %3111 = vmatpush3.msra.mxu1 %v3448_v38  ;;  %3112 = vmatprep.mubr.msk.f32.mxu1 %vm3350_vm1, %v3349_v7 }
  0x22   :  { %3116 = vmatpush3.msra.mxu0 %v3415_v31  ;;  %3113 = vmatmul.mubr.f32.vlgmr.msra.gmra.mxu1 %v3349_v7 }
  0x23   :  { %3117 = vmatprep.subr.mxu0 %v3349_v7  ;;  %3122 = vmatprep.subr.mxu1 %v3349_v7 }
  0x24   :  { %3118 = vmatpush3.msra.mxu0 %v3419_v32  ;;  %3119 = vmatprep.mubr.msk.f32.mxu0 %vm3350_vm1, %v3349_v7 }
  0x25   :  { %3123 = vmatpush3.msra.mxu1 %v3410_v27  ;;  %3120 = vmatmul.mubr.f32.vlgmr.msra.gmra.mxu0 %v3349_v7 }
  0x26   :  { %3124 = vmatprep.subr.mxu1 %v3349_v7  ;;  %3129 = vmatprep.subr.mxu0 %v3349_v7 }
  0x27   :  { %3125 = vmatpush3.msra.mxu1 %v3412_v30  ;;  %3126 = vmatprep.mubr.msk.f32.mxu1 %vm3350_vm1, %v3349_v7 }
  0x28   :  { %3130 = vmatpush3.msra.mxu0 %v3424_v33  ;;  %3127 = vmatmul.mubr.f32.vlgmr.msra.gmra.mxu1 %v3349_v7 }
  0x29   :  { %3131 = vmatprep.subr.mxu0 %v3349_v7  ;;  %3136 = vmatprep.subr.mxu1 %v3349_v7 }
  0x2a   :  { %3132 = vmatpush3.msra.mxu0 %v3429_v34  ;;  %3133 = vmatprep.mubr.msk.f32.mxu0 %vm3350_vm1, %v3349_v7 }
  0x2b   :  { %3137 = vmatpush3.msra.mxu1 %v3410_v27  ;;  %3134 = vmatmul.mubr.f32.vlgmr.msra.gmra.mxu0 %v3349_v7 }
  0x2c   :  { %3138 = vmatprep.subr.mxu1 %v3349_v7  ;;  %3140 = vmatprep.mubr.msk.f32.mxu1 %vm3350_vm1, %v3349_v7 }
  0x2d   :  { %3139 = vmatpush3.msra.mxu1 %v3412_v30  ;;  %3143 = vmatprep.subr.mxu0 %v3349_v7 }
  0x2e   :  { %3141 = vmatmul.mubr.f32.vlgmr.msra.gmra.mxu1 %v3349_v7  ;;  %3150 = vmatprep.subr.mxu1 %v3349_v7 }
  0x2f   :  { %3151 = vmatpush3.msra.mxu1 %v3442_v37  ;;  %3154 = vmatprep.mubr.msk.f32.mxu1 %vm3350_vm1, %v3349_v7 }
  0x30   :  { %3152 = vmatprep.subr.mxu1 %v3349_v7  ;;  %3144 = vmatpush3.msra.mxu0 %v3410_v27 }
  0x31   :  { %3153 = vmatpush3.msra.mxu1 %v3448_v38  ;;  %3145 = vmatprep.subr.mxu0 %v3349_v7 }
  0x32   :  { %3164 = vmatprep.subr.mxu1 %v3349_v7  ;;  %3146 = vmatpush3.msra.mxu0 %v3412_v30 }
  0x33   :  { %3147 = vmatprep.mubr.msk.f32.mxu0 %vm3350_vm1, %v3349_v7  ;;  %3157 = vmatprep.subr.mxu0 %v3349_v7 }
  0xcf   :  { %v3065_v44 = vpop.f32.mrf.mxu0 }
  0xd0   :  { %v114_v45 = vadd.f32 %v3065_v44, %v22_v43  ;;  %v3072_v47 = vpop.f32.mrf.mxu1 }
  0xd1   :  { %v103_v46 = vpop.f32.mrf.mxu0 }
  0xd2   :  { %v201_v48 = vadd.f32 %v3072_v47, %v114_v45  ;;  %v194_v49 = vpop.f32.mrf.mxu1  ;;  %v104_v57 = vadd.f32 %v103_v46, %v22_v43 }
  0xd3   :  { %v3079_v50 = vpop.f32.mrf.mxu0 }
  0xd4   :  { %v284_v51 = vadd.f32 %v3079_v50, %v201_v48  ;;  %v195_v62 = vadd.f32 %v194_v49, %v104_v57 }
  0xd5   :  { %v276_v52 = vpop.f32.mrf.mxu0 }
  0xd6   :  { %v3086_v53 = vpop.f32.mrf.mxu1  ;;  %v277_v2 = vadd.f32 %v276_v52, %v195_v62 }
  0xd7   :  { %v367_v54 = vadd.f32 %v3086_v53, %v284_v51 }
  0xd8   :  { %v358_v55 = vpop.f32.mrf.mxu1 }
  0xd9   :  { %v3093_v56 = vpop.f32.mrf.mxu0  ;;  %v359_v8 = vadd.f32 %v358_v55, %v277_v2 }
  0xda   :  { %v450_v58 = vadd.f32 %v3093_v56, %v367_v54 }
  0xdb   :  { %v443_v59 = vpop.f32.mrf.mxu0 }
  0xdc   :  { %v3100_v60 = vpop.f32.mrf.mxu1  ;;  %v444_v13 = vadd.f32 %v443_v59, %v359_v8 }
  0xdd   :  { %v3513_v61 = vadd.f32 %v3100_v60, %v450_v58 }
  0xde   :  { %v522_v63 = vpop.f32.mrf.mxu1 }
  0xdf   :  { %v610_v0 = vpop.f32.mrf.mxu0  ;;  %v3515_v19 = vadd.f32 %v522_v63, %v444_v13 }
  0xe1   :  { %v3107_v1 = vpop.f32.mrf.mxu0 }
  0xe2   :  { %v691_v3 = vpop.f32.mrf.mxu1 }
  0xe3   :  { %v692_v4 = vadd.f32 %v691_v3, %v610_v0 }
  0xe4   :  { %v3114_v5 = vpop.f32.mrf.mxu1 }
  0xe5   :  { %v767_v6 = vpop.f32.mrf.mxu0 }
  0xe6   :  { %v768_v9 = vadd.f32 %v767_v6, %v692_v4 }
  0xe7   :  { %v3121_v10 = vpop.f32.mrf.mxu0 }
  0xe8   :  { %v842_v11 = vpop.f32.mrf.mxu1 }
  0xe9   :  { %v843_v12 = vadd.f32 %v842_v11, %v768_v9 }
  0xea   :  { %v3128_v14 = vpop.f32.mrf.mxu1 }
  0xeb   :  { %v919_v15 = vpop.f32.mrf.mxu0 }
  0xec   :  { %v920_v16 = vadd.f32 %v919_v15, %v843_v12 }
  0xed   :  { %v3135_v17 = vpop.f32.mrf.mxu0 }
  0xee   :  { %v992_v18 = vpop.f32.mrf.mxu1 }
  0xef   :  { %v993_v20 = vadd.f32 %v992_v18, %v920_v16 }
  0xf0   :  { %v3142_v21 = vpop.f32.mrf.mxu1 }
  0xf1   :  { %v996_v22 = vadd.f32 %v993_v20, %v3515_v19 }
  0xf3   :  { %3317 = vtanh.f32 %v996_v22 }
 0x100   :  { %v3318_v23 = vpop.eup %3317 }
 0x101   :  { %999 = vst.msk [vmem:[#allocation2] sm:$0x3] %vm998_vm2, %v3318_v23  ;;  %v1001_v24 = vsel %vm23_vm0, %v3318_v23, 0 }
 0x102   :  { %v1070_v25 = vand.u32 4294901760, %v1001_v24 }
 0x104   :  { %v1071_v26 = vsub.f32 %v1001_v24, %v1070_v25  ;;  %3155 = vmatmul.mubr.f32.vlgmr.msra.gmra.mxu1 %v1070_v25 }
 0x105   :  { %3165 = vmatpush3.msra.mxu1 %v3410_v27  ;;  %3168 = vmatprep.mubr.msk.f32.mxu1 %vm3350_vm1, %v3349_v7 }
 0x106   :  { %3166 = vmatprep.subr.mxu1 %v3349_v7  ;;  %v1072_v28 = vand.u32 4294901760, %v1071_v26 }
 0x107   :  { %3167 = vmatpush3.msra.mxu1 %v3412_v30 }
 0x108   :  { %3169 = vmatmul.mubr.f32.vlgmr.msra.gmra.mxu1 %v1072_v28  ;;  %3178 = vmatprep.subr.mxu1 %v3349_v7  ;;  %v1073_v29 = vsub.f32 %v1071_v26, %v1072_v28 }
 0x109   :  { %3179 = vmatpush3.msra.mxu1 %v3410_v27  ;;  %3182 = vmatprep.mubr.msk.f32.mxu1 %vm3350_vm1, %v3349_v7 }
 0x10a   :  { %3180 = vmatprep.subr.mxu1 %v3349_v7  ;;  %v1074_v35 = vand.u32 4294901760, %v1073_v29 }
 0x10b   :  { %3181 = vmatpush3.msra.mxu1 %v3412_v30 }
 0x10c   :  { %3148 = vmatmul.mubr.f32.vlgmr.msra.gmra.mxu0 %v1074_v35  ;;  %3183 = vmatmul.mubr.f32.vlgmr.msra.gmra.mxu1 %v1070_v25 }
 0x10d   :  { %3158 = vmatpush3.msra.mxu0 %v3415_v31  ;;  %3161 = vmatprep.mubr.msk.f32.mxu0 %vm3350_vm1, %v3349_v7 }
 0x10e   :  { %3159 = vmatprep.subr.mxu0 %v3349_v7  ;;  %3192 = vmatprep.subr.mxu1 %v3349_v7 }
 0x10f   :  { %3160 = vmatpush3.msra.mxu0 %v3419_v32  ;;  %3193 = vmatpush3.msra.mxu1 %v3442_v37 }
 0x110   :  { %3162 = vmatmul.mubr.f32.vlgmr.msra.gmra.mxu0 %v1071_v26  ;;  %3171 = vmatprep.subr.mxu0 %v3349_v7 }
 0x111   :  { %3172 = vmatpush3.msra.mxu0 %v3424_v33  ;;  %3175 = vmatprep.mubr.msk.f32.mxu0 %vm3350_vm1, %v3349_v7 }
 0x112   :  { %3173 = vmatprep.subr.mxu0 %v3349_v7  ;;  %3194 = vmatprep.subr.mxu1 %v3349_v7 }
 0x113   :  { %3174 = vmatpush3.msra.mxu0 %v3429_v34  ;;  %3195 = vmatpush3.msra.mxu1 %v3448_v38 }
 0x114   :  { %3176 = vmatmul.mubr.f32.vlgmr.msra.gmra.mxu0 %v1070_v25  ;;  %3196 = vmatprep.mubr.msk.f32.mxu1 %vm3350_vm1, %v3349_v7 }
 0x115   :  { %3206 = vmatprep.subr.mxu1 %v3349_v7  ;;  %3185 = vmatprep.subr.mxu0 %v3349_v7 }
 0x116   :  { %3186 = vmatpush3.msra.mxu0 %v3410_v27  ;;  %3189 = vmatprep.mubr.msk.f32.mxu0 %vm3350_vm1, %v3349_v7 }
 0x117   :  { %3187 = vmatprep.subr.mxu0 %v3349_v7 }
 0x118   :  { %3188 = vmatpush3.msra.mxu0 %v3412_v30 }
 0x119   :  { %3199 = vmatprep.subr.mxu0 %v3349_v7 }
 0x1c4   :  { %v1157_v36 = vpop.f32.mrf.mxu1 }
 0x1c6   :  { %v3156_v41 = vpop.f32.mrf.mxu1 }
 0x1c8   :  { %v1308_v43 = vpop.f32.mrf.mxu1 }
 0x1ca   :  { %v3170_v44 = vpop.f32.mrf.mxu1 }
 0x1cc   :  { %v1076_v45 = vpop.f32.mrf.mxu0  ;;  %v1458_v46 = vpop.f32.mrf.mxu1 }
 0x1cd   :  { %v1158_v49 = vadd.f32 %v1157_v36, %v1076_v45 }
 0x1ce   :  { %v3149_v47 = vpop.f32.mrf.mxu0  ;;  %v3184_v48 = vpop.f32.mrf.mxu1 }
 0x1d0   :  { %v1233_v50 = vpop.f32.mrf.mxu0 }
 0x1d1   :  { %v1234_v51 = vadd.f32 %v1233_v50, %v1158_v49 }
 0x1d2   :  { %v3163_v52 = vpop.f32.mrf.mxu0 }
 0x1d3   :  { %v1309_v53 = vadd.f32 %v1308_v43, %v1234_v51 }
 0x1d4   :  { %v1385_v54 = vpop.f32.mrf.mxu0 }
 0x1d5   :  { %v1386_v55 = vadd.f32 %v1385_v54, %v1309_v53 }
 0x1d6   :  { %v3177_v56 = vpop.f32.mrf.mxu0 }
 0x1d7   :  { %v1459_v57 = vadd.f32 %v1458_v46, %v1386_v55 }
 0x1d9   :  { %v1463_v58 = vrot.slane %v1459_v57, 6 }
 0x1db   :  { %v1465_v59 = vadd.f32 %v1463_v58, %v3515_v19 }
 0x1dd   :  { %3319 = vtanh.f32 %v1465_v59 }
 0x1ea   :  { %v3320_v60 = vpop.eup %3319 }
 0x1eb   :  { %v1470_v62 = vrot.slane %v3320_v60, 2  ;;  %1468 = vst.msk [vmem:[#allocation2] sm:$0xc] %vm1467_vm3, %v3320_v60 }
 0x1ed   :  { %v1471_v63 = vsel %vm23_vm0, %v1470_v62, 0 }
 0x1ee   :  { %v1540_v0 = vand.u32 4294901760, %v1471_v63 }
 0x1f0   :  { %v1541_v1 = vsub.f32 %v1471_v63, %v1540_v0  ;;  %3197 = vmatmul.mubr.f32.vlgmr.msra.gmra.mxu1 %v1540_v0 }
 0x1f1   :  { %3207 = vmatpush3.msra.mxu1 %v3410_v27  ;;  %3210 = vmatprep.mubr.msk.f32.mxu1 %vm3350_vm1, %v3349_v7 }
 0x1f2   :  { %3208 = vmatprep.subr.mxu1 %v3349_v7  ;;  %v1542_v2 = vand.u32 4294901760, %v1541_v1 }
 0x1f3   :  { %3209 = vmatpush3.msra.mxu1 %v3412_v30 }
 0x1f4   :  { %3211 = vmatmul.mubr.f32.vlgmr.msra.gmra.mxu1 %v1542_v2  ;;  %3220 = vmatprep.subr.mxu1 %v3349_v7  ;;  %v1543_v3 = vsub.f32 %v1541_v1, %v1542_v2 }
 0x1f5   :  { %3221 = vmatpush3.msra.mxu1 %v3410_v27  ;;  %3224 = vmatprep.mubr.msk.f32.mxu1 %vm3350_vm1, %v3349_v7 }
 0x1f6   :  { %3222 = vmatprep.subr.mxu1 %v3349_v7  ;;  %v1544_v4 = vand.u32 4294901760, %v1543_v3  ;;  %v2879_v3 = vsub.s32 1, %v3504_v40 }
 0x1f7   :  { %3223 = vmatpush3.msra.mxu1 %v3412_v30 }
 0x1f8   :  { %3190 = vmatmul.mubr.f32.vlgmr.msra.gmra.mxu0 %v1544_v4  ;;  %3225 = vmatmul.mubr.f32.vlgmr.msra.gmra.mxu1 %v1540_v0 }
 0x1f9   :  { %3200 = vmatpush3.msra.mxu0 %v3415_v31  ;;  %3203 = vmatprep.mubr.msk.f32.mxu0 %vm3350_vm1, %v3349_v7 }
 0x1fa   :  { %3201 = vmatprep.subr.mxu0 %v3349_v7  ;;  %3234 = vmatprep.subr.mxu1 %v3349_v7 }
 0x1fb   :  { %3202 = vmatpush3.msra.mxu0 %v3419_v32  ;;  %3235 = vmatpush3.msra.mxu1 %v3442_v37 }
 0x1fc   :  { %3204 = vmatmul.mubr.f32.vlgmr.msra.gmra.mxu0 %v1541_v1  ;;  %3213 = vmatprep.subr.mxu0 %v3349_v7 }
 0x1fd   :  { %3214 = vmatpush3.msra.mxu0 %v3424_v33  ;;  %3217 = vmatprep.mubr.msk.f32.mxu0 %vm3350_vm1, %v3349_v7 }
 0x1fe   :  { %3215 = vmatprep.subr.mxu0 %v3349_v7  ;;  %3236 = vmatprep.subr.mxu1 %v3349_v7 }
 0x1ff   :  { %3216 = vmatpush3.msra.mxu0 %v3429_v34  ;;  %3237 = vmatpush3.msra.mxu1 %v3448_v38 }
 0x200   :  { %3218 = vmatmul.mubr.f32.vlgmr.msra.gmra.mxu0 %v1540_v0  ;;  %3238 = vmatprep.mubr.msk.f32.mxu1 %vm3350_vm1, %v3349_v7 }
 0x201   :  { %3248 = vmatprep.subr.mxu1 %v3349_v7  ;;  %3227 = vmatprep.subr.mxu0 %v3349_v7 }
 0x202   :  { %3228 = vmatpush3.msra.mxu0 %v3410_v27  ;;  %3231 = vmatprep.mubr.msk.f32.mxu0 %vm3350_vm1, %v3349_v7 }
 0x203   :  { %3229 = vmatprep.subr.mxu0 %v3349_v7 }
 0x204   :  { %3230 = vmatpush3.msra.mxu0 %v3412_v30 }
 0x205   :  { %3241 = vmatprep.subr.mxu0 %v3349_v7 }
 0x2b0   :  { %v1627_v5 = vpop.f32.mrf.mxu1 }
 0x2b2   :  { %v3198_v6 = vpop.f32.mrf.mxu1 }
 0x2b3   :  { %v2880_v6 = vrot.slane %v3510_v42, %v2879_v3 }
 0x2b4   :  { %v1778_v8 = vpop.f32.mrf.mxu1 }
 0x2b6   :  { %v3212_v9 = vpop.f32.mrf.mxu1 }
 0x2b8   :  { %v1546_v10 = vpop.f32.mrf.mxu0  ;;  %v1928_v11 = vpop.f32.mrf.mxu1 }
 0x2b9   :  { %v1628_v14 = vadd.f32 %v1627_v5, %v1546_v10 }
 0x2ba   :  { %v3191_v12 = vpop.f32.mrf.mxu0  ;;  %v3226_v13 = vpop.f32.mrf.mxu1 }
 0x2bc   :  { %v1703_v15 = vpop.f32.mrf.mxu0 }
 0x2bd   :  { %v1704_v16 = vadd.f32 %v1703_v15, %v1628_v14 }
 0x2be   :  { %v3205_v17 = vpop.f32.mrf.mxu0 }
 0x2bf   :  { %v1779_v18 = vadd.f32 %v1778_v8, %v1704_v16 }
 0x2c0   :  { %v1855_v20 = vpop.f32.mrf.mxu0 }
 0x2c1   :  { %v1856_v21 = vadd.f32 %v1855_v20, %v1779_v18 }
 0x2c2   :  { %v3219_v22 = vpop.f32.mrf.mxu0 }
 0x2c3   :  { %v1929_v23 = vadd.f32 %v1928_v11, %v1856_v21 }
 0x2c5   :  { %v1933_v24 = vrot.slane %v1929_v23, 4 }
 0x2c7   :  { %v1935_v25 = vadd.f32 %v1933_v24, %v3515_v19 }
 0x2c9   :  { %3321 = vtanh.f32 %v1935_v25 }
 0x2d6   :  { %v3322_v26 = vpop.eup %3321 }
 0x2d7   :  { %v1940_v28 = vrot.slane %v3322_v26, 4  ;;  %1938 = vst.msk [vmem:[#allocation2] sm:$0x30] %vm1937_vm4, %v3322_v26 }
 0x2d9   :  { %v1941_v29 = vsel %vm23_vm0, %v1940_v28, 0 }
 0x2da   :  { %v2010_v35 = vand.u32 4294901760, %v1941_v29 }
 0x2dc   :  { %v2011_v36 = vsub.f32 %v1941_v29, %v2010_v35  ;;  %3239 = vmatmul.mubr.f32.vlgmr.msra.gmra.mxu1 %v2010_v35 }
 0x2dd   :  { %3249 = vmatpush3.msra.mxu1 %v3410_v27  ;;  %3252 = vmatprep.mubr.msk.f32.mxu1 %vm3350_vm1, %v3349_v7 }
 0x2de   :  { %3250 = vmatprep.subr.mxu1 %v3349_v7  ;;  %v2012_v41 = vand.u32 4294901760, %v2011_v36 }
 0x2df   :  { %3251 = vmatpush3.msra.mxu1 %v3412_v30 }
 0x2e0   :  { %3253 = vmatmul.mubr.f32.vlgmr.msra.gmra.mxu1 %v2012_v41  ;;  %3262 = vmatprep.subr.mxu1 %v3349_v7  ;;  %v2013_v43 = vsub.f32 %v2011_v36, %v2012_v41 }
 0x2e1   :  { %3263 = vmatpush3.msra.mxu1 %v3410_v27  ;;  %3266 = vmatprep.mubr.msk.f32.mxu1 %vm3350_vm1, %v3349_v7 }
 0x2e2   :  { %3264 = vmatprep.subr.mxu1 %v3349_v7  ;;  %v2014_v44 = vand.u32 4294901760, %v2013_v43 }
 0x2e3   :  { %3265 = vmatpush3.msra.mxu1 %v3412_v30 }
 0x2e4   :  { %3232 = vmatmul.mubr.f32.vlgmr.msra.gmra.mxu0 %v2014_v44  ;;  %3267 = vmatmul.mubr.f32.vlgmr.msra.gmra.mxu1 %v2010_v35 }
 0x2e5   :  { %3242 = vmatpush3.msra.mxu0 %v3415_v31  ;;  %3245 = vmatprep.mubr.msk.f32.mxu0 %vm3350_vm1, %v3349_v7 }
 0x2e6   :  { %3243 = vmatprep.subr.mxu0 %v3349_v7  ;;  %3276 = vmatprep.subr.mxu1 %v3349_v7 }
 0x2e7   :  { %3244 = vmatpush3.msra.mxu0 %v3419_v32  ;;  %3277 = vmatpush3.msra.mxu1 %v3442_v37  ;;  %v2892_v37 = vsub.s32 2, %v3504_v40 }
 0x2e8   :  { %3246 = vmatmul.mubr.f32.vlgmr.msra.gmra.mxu0 %v2011_v36  ;;  %3255 = vmatprep.subr.mxu0 %v3349_v7 }
 0x2e9   :  { %3256 = vmatpush3.msra.mxu0 %v3424_v33  ;;  %3259 = vmatprep.mubr.msk.f32.mxu0 %vm3350_vm1, %v3349_v7 }
 0x2ea   :  { %3257 = vmatprep.subr.mxu0 %v3349_v7  ;;  %3278 = vmatprep.subr.mxu1 %v3349_v7 }
 0x2eb   :  { %3258 = vmatpush3.msra.mxu0 %v3429_v34  ;;  %3279 = vmatpush3.msra.mxu1 %v3448_v38  ;;  %v2893_v38 = vrot.slane %v3510_v42, %v2892_v37 }
 0x2ec   :  { %3260 = vmatmul.mubr.f32.vlgmr.msra.gmra.mxu0 %v2010_v35  ;;  %3280 = vmatprep.mubr.msk.f32.mxu1 %vm3350_vm1, %v3349_v7 }
 0x2ed   :  { %3290 = vmatprep.subr.mxu1 %v3349_v7  ;;  %3269 = vmatprep.subr.mxu0 %v3349_v7 }
 0x2ee   :  { %3270 = vmatpush3.msra.mxu0 %v3410_v27  ;;  %3273 = vmatprep.mubr.msk.f32.mxu0 %vm3350_vm1, %v3349_v7 }
 0x2ef   :  { %3271 = vmatprep.subr.mxu0 %v3349_v7  ;;  %2895 = vbcast.lane.b32.xlu1 %v2893_v38, 256 }
 0x2f0   :  { %3272 = vmatpush3.msra.mxu0 %v3412_v30 }
 0x2f1   :  { %3283 = vmatprep.subr.mxu0 %v3349_v7 }
 0x2f3   :  { %2899 = vbcast.lane.b32.xlu1 %v2893_v38, 264 }
 0x361   :  { %v2896_v36 = vpop.permute.xlu1 %2895 }
 0x365   :  { %v2900_v44 = vpop.permute.xlu1 %2899 }
 0x39c   :  { %v2097_v45 = vpop.f32.mrf.mxu1 }
 0x39e   :  { %v3240_v46 = vpop.f32.mrf.mxu1 }
 0x3a0   :  { %v2248_v47 = vpop.f32.mrf.mxu1 }
 0x3a2   :  { %v3254_v48 = vpop.f32.mrf.mxu1 }
 0x3a4   :  { %v2016_v49 = vpop.f32.mrf.mxu0  ;;  %v2398_v50 = vpop.f32.mrf.mxu1 }
 0x3a5   :  { %v2098_v53 = vadd.f32 %v2097_v45, %v2016_v49 }
 0x3a6   :  { %v3233_v51 = vpop.f32.mrf.mxu0  ;;  %v3268_v52 = vpop.f32.mrf.mxu1 }
 0x3a8   :  { %v2173_v54 = vpop.f32.mrf.mxu0 }
 0x3a9   :  { %v2174_v55 = vadd.f32 %v2173_v54, %v2098_v53 }
 0x3aa   :  { %v3247_v56 = vpop.f32.mrf.mxu0 }
 0x3ab   :  { %v2249_v57 = vadd.f32 %v2248_v47, %v2174_v55 }
 0x3ac   :  { %v2325_v58 = vpop.f32.mrf.mxu0 }
 0x3ad   :  { %v2326_v59 = vadd.f32 %v2325_v58, %v2249_v57 }
 0x3ae   :  { %v3261_v60 = vpop.f32.mrf.mxu0 }
 0x3af   :  { %v2399_v62 = vadd.f32 %v2398_v50, %v2326_v59 }
 0x3b1   :  { %v2403_v63 = vrot.slane %v2399_v62, 2 }
 0x3b3   :  { %v2405_v0 = vadd.f32 %v2403_v63, %v3515_v19 }
 0x3b5   :  { %3323 = vtanh.f32 %v2405_v0 }
 0x3c2   :  { %v3324_v1 = vpop.eup %3323 }
 0x3c3   :  { %v2410_v2 = vrot.slane %v3324_v1, 6  ;;  %2408 = vst.msk [vmem:[#allocation2] sm:$0xc0] %vm2407_vm5, %v3324_v1 }
 0x3c5   :  { %v2411_v4 = vsel %vm23_vm0, %v2410_v2, 0 }
 0x3c6   :  { %v2480_v5 = vand.u32 4294901760, %v2411_v4 }
 0x3c8   :  { %v2481_v8 = vsub.f32 %v2411_v4, %v2480_v5  ;;  %3281 = vmatmul.mubr.f32.vlgmr.msra.gmra.mxu1 %v2480_v5 }
 0x3c9   :  { %3291 = vmatpush3.msra.mxu1 %v3410_v27  ;;  %3294 = vmatprep.mubr.msk.f32.mxu1 %vm3350_vm1, %v3349_v7 }
 0x3ca   :  { %3292 = vmatprep.subr.mxu1 %v3349_v7  ;;  %v2482_v19 = vand.u32 4294901760, %v2481_v8  ;;  %v2875_v9 = vld [vmem:[#allocation2] sm:$0xff] }
 0x3cb   :  { %3293 = vmatpush3.msra.mxu1 %v3412_v30  ;;  %v2881_v10 = vmul.f32 %v2880_v6, %v2875_v9 }
 0x3cc   :  { %3295 = vmatmul.mubr.f32.vlgmr.msra.gmra.mxu1 %v2482_v19  ;;  %3304 = vmatprep.subr.mxu1 %v3349_v7  ;;  %v2483_v11 = vsub.f32 %v2481_v8, %v2482_v19 }
 0x3cd   :  { %3305 = vmatpush3.msra.mxu1 %v3410_v27  ;;  %v2883_v42 = vsel %vm23_vm0, %v2881_v10, 0.0  ;;  %3308 = vmatprep.mubr.msk.f32.mxu1 %vm3350_vm1, %v3349_v7  ;;  %v3351_v27 = vmov 0  }
 0x3ce   :  { %3306 = vmatprep.subr.mxu1 %v3349_v7  ;;  %2884 = vadd.xlane.f32.xlu0 %v2883_v42  ;;  %v2484_v12 = vand.u32 4294901760, %v2483_v11 }
 0x3cf   :  { %3307 = vmatpush3.msra.mxu1 %v3412_v30  ;;  %3315 = vset.pattern.permute.xlu0 %v3351_v27 }
 0x3d0   :  { %3274 = vmatmul.mubr.f32.vlgmr.msra.gmra.mxu0 %v2484_v12  ;;  %3309 = vmatmul.mubr.f32.vlgmr.msra.gmra.mxu1 %v2480_v5 }
 0x3d1   :  { %3284 = vmatpush3.msra.mxu0 %v3415_v31  ;;  %3287 = vmatprep.mubr.msk.f32.mxu0 %vm3350_vm1, %v3349_v7 }
 0x3d2   :  { %3285 = vmatprep.subr.mxu0 %v3349_v7  ;;  %3316 = vset.pattern.permute.xlu1 %v3351_v27 }
 0x3d3   :  { %3286 = vmatpush3.msra.mxu0 %v3419_v32 }
 0x3d4   :  { %3288 = vmatmul.mubr.f32.vlgmr.msra.gmra.mxu0 %v2481_v8  ;;  %3297 = vmatprep.subr.mxu0 %v3349_v7 }
 0x3d5   :  { %3298 = vmatpush3.msra.mxu0 %v3424_v33  ;;  %3301 = vmatprep.mubr.msk.f32.mxu0 %vm3350_vm1, %v3349_v7 }
 0x3d6   :  { %3299 = vmatprep.subr.mxu0 %v3349_v7 }
 0x3d7   :  { %3300 = vmatpush3.msra.mxu0 %v3429_v34 }
 0x3d8   :  { %3302 = vmatmul.mubr.f32.vlgmr.msra.gmra.mxu0 %v2480_v5 }
 0x457   :  { %v2885_v41 = vpop.xlane.xlu0 %2884 }
 0x458   :  { %v2903_v43 = vadd.f32 %v2896_v36, %v2885_v41 }
 0x488   :  { %v2567_v30 = vpop.f32.mrf.mxu1 }
 0x48a   :  { %v3282_v31 = vpop.f32.mrf.mxu1 }
 0x48c   :  { %v2718_v13 = vpop.f32.mrf.mxu1 }
 0x48e   :  { %v3296_v32 = vpop.f32.mrf.mxu1 }
 0x490   :  { %v2486_v14 = vpop.f32.mrf.mxu0  ;;  %v2868_v15 = vpop.f32.mrf.mxu1 }
 0x491   :  { %v2568_v33 = vadd.f32 %v2567_v30, %v2486_v14 }
 0x492   :  { %v3275_v16 = vpop.f32.mrf.mxu0  ;;  %v3310_v17 = vpop.f32.mrf.mxu1 }
 0x494   :  { %v2643_v18 = vpop.f32.mrf.mxu0 }
 0x495   :  { %v2644_v20 = vadd.f32 %v2643_v18, %v2568_v33 }
 0x496   :  { %v3289_v21 = vpop.f32.mrf.mxu0 }
 0x497   :  { %v2719_v22 = vadd.f32 %v2718_v13, %v2644_v20 }
 0x498   :  { %v2795_v7 = vpop.f32.mrf.mxu0 }
 0x499   :  { %v2796_v23 = vadd.f32 %v2795_v7, %v2719_v22 }
 0x49a   :  { %v3303_v34 = vpop.f32.mrf.mxu0 }
 0x49b   :  { %v2869_v24 = vadd.f32 %v2868_v15, %v2796_v23 }
 0x49d   :  { %v2872_v25 = vadd.f32 %v2869_v24, %v3513_v61  ;;  %v2915_v61 = vand.u32 127, %v19_v39 }
 0x49f   :  { %3325 = vtanh.f32 %v2872_v25  ;;  %v2920_v45 = vadd.s32 4294967288, %v2915_v61  ;;  %v2918_v46 = vsub.s32 %v2915_v61, %v3504_v40 }
 0x4a1   :  { %v2923_v47 = vsub.s32 %v2920_v45, %v3504_v40 }
 0x4ac   :  { %v3326_v26 = vpop.eup %3325 }
 0x4ad   :  { %2874 = vst.msk [vmem:[#allocation2 + $0x8] sm:$0x3] %vm998_vm2, %v3326_v26  ;;  %2930 = vst.msk [vmem:[#allocation3 + $0x1] sm:$0x3] %vm998_vm2, %v3326_v26 }
 0x4b4   :  { %v2876_v28 = vld [vmem:[#allocation2 + $0x8] sm:$0xff] }
 0x4b5   :  { %v2882_v29 = vmul.f32 %v2880_v6, %v2876_v28 }
 0x4b7   :  { %v2886_v35 = vsel %vm23_vm0, %v2882_v29, 0.0 }
 0x4b8   :  { %2887 = vadd.xlane.f32.xlu0 %v2886_v35 }
 0x4ce   :  { %2909 = vperm.xlu0 %3315, %v2903_v43  }
 0x541   :  { %v2888_v37 = vpop.xlane.xlu0 %2887 }
 0x542   :  { %v2904_v38 = vadd.f32 %v2900_v44, %v2888_v37 }
 0x544   :  { %2912 = vperm.xlu1 %3316, %v2904_v38  }
 0x549   :  { %v2910_v48 = vpop.permute.xlu0 %2909 }
 0x54a   :  { %v2919_v50 = vrot.slane %v2910_v48, %v2918_v46 }
 0x5bf   :  { %v2913_v49 = vpop.permute.xlu1 %2912 }
 0x5c0   :  { %v2924_v51 = vrot.slane %v2913_v49, %v2923_v47 }
 0x5c2   :  { %v2926_v52 = vsel %vm2925_vm6, %v2924_v51, %v2919_v50 }
 0x5c3   :  { %2929 = vst.msk [vmem:[#allocation3] sm:$0x1] %vm2928_vm7, %v2926_v52 }
 0x5c4   :  { %3338 = shalt.err (!%p3335_p4)
}
 0x5c5   :  { %2940 = dma.vmem_to_hbm [thread:$0]  %s2938_s22, 128, %s3673_s2, [#allocation4]  }
 0x5c6   :  { %3347 = dma.done.wait [#allocation4], 128  }
 0x5c7   :  { %3348 = vsyncadd [#allocation4], 4294967168 }
 0x5c8   :  { %2944 = vsyncpa [#allocation4], 1 }

</bundles_post_ra>
